<compile_context>
chip_gen: v7x
topology: tpu7x:2x2x1
jax: 0.10.0
libtpu: 0.0.40
codegen_flags: <defaults>
</compile_context>

<pallas_src>
import jax
import jax.numpy as jnp
import numpy as np
from jax.experimental import pallas as pl
from jax.experimental.pallas import tpu as pltpu

ROW_PACK = 4  # logical rows packed per vreg row: 4 * 32 input dims = 128 lanes


def _cdiv(a, b):
    return -(-a // b)


def _round_up(a, b):
    return _cdiv(a, b) * b


def _depthnet3_kernel(x_ref, w1_ref, b1_ref, w2_ref, b2_ref, o_ref):
    # x:  (TM, ROW_PACK*D_in)           w1: (ROW_PACK*D_in, ROW_PACK*F) block-diag
    # b1: (1, ROW_PACK*F)               w2: (ROW_PACK*F, ROW_PACK)      block-diag
    # b2: (1,) scalar in SMEM           o:  (TM, ROW_PACK)
    h = jnp.dot(x_ref[...], w1_ref[...], preferred_element_type=jnp.float32)
    h = jnp.maximum(h + b1_ref[...], 0.0)
    y = jnp.dot(h, w2_ref[...], preferred_element_type=jnp.float32) + b2_ref[0]
    o_ref[...] = y.astype(o_ref.dtype)


def pack_depthnet3_params(w1, b1, w2, b2, *, x_dtype=jnp.float32):
    """Pack nn.Linear weights into block-diagonal lane-packed form.

    Hoisted out of the per-call path (pay the kron/tile once per parameter
    set).  w1: (F, D_in), b1: (F,), w2: (1, F), b2: (1,).  x_dtype is the
    dtype x will be streamed in (jnp.bfloat16 halves HBM traffic; the matmul
    still accumulates in f32).
    """
    num_features, d_in = int(w1.shape[0]), int(w1.shape[1])
    eye = jnp.eye(ROW_PACK, dtype=jnp.float32)
    w1_bd = jnp.kron(eye, jnp.asarray(w1, jnp.float32).T).astype(x_dtype)   # (4*D, 4*F)
    w2_bd = jnp.kron(eye, jnp.asarray(w2, jnp.float32).T)                    # (4*F, 4) f32
    b1_t = jnp.tile(jnp.asarray(b1, jnp.float32).reshape(1, num_features),
                    (1, ROW_PACK))                                           # (1, 4*F)
    b2_s = jnp.asarray(b2, jnp.float32).reshape(1)                           # (1,) -> SMEM
    return dict(w1_bd=w1_bd, b1_t=b1_t, w2_bd=w2_bd, b2_s=b2_s,
                d_in=d_in, num_features=num_features)


def depthnet3_forward(x_nchw, params, *, tm_packed=8192):
    """x_nchw: (N, nF, H, W) with nF*H*W == input_dim.  Returns (N, 1) f32.

    tm_packed: packed rows per grid block (1 packed row = ROW_PACK logical
    rows).  Default 8192 -> 4 MiB f32 (2 MiB bf16) x tile per step.
    """
    w1_bd, b1_t = params["w1_bd"], params["b1_t"]
    w2_bd, b2_s = params["w2_bd"], params["b2_s"]
    d_in, num_features = params["d_in"], params["num_features"]

    N = int(x_nchw.shape[0])
    assert int(np.prod(x_nchw.shape[1:])) == d_in, "nF*H*W must equal input_dim"

    d_pack = ROW_PACK * d_in            # 128 lanes for d_in == 32
    f_pack = ROW_PACK * num_features    # 64

    # ---- flatten exactly like torch .view(N, -1); pad only to a multiple of
    # ROW_PACK (<= 3 rows).  When N % ROW_PACK == 0 (the common case) this is
    # a no-op: the reshapes below are free bitcasts and x is never copied. ----
    x_flat = x_nchw.reshape(N, d_in).astype(w1_bd.dtype)
    n4 = _round_up(N, ROW_PACK)
    if n4 != N:
        x_flat = jnp.pad(x_flat, ((0, n4 - N), (0, 0)))
    packed_n = n4 // ROW_PACK
    x_packed = x_flat.reshape(packed_n, d_pack)

    # ---- tile selection: big tiles for bandwidth; >= 2 (preferably even)
    # grid steps so the "parallel" axis feeds both v7x TensorCores; sublane
    # (x8) aligned.  The last block may be partial: Pallas masks OOB output
    # stores and the compute is strictly row-local, so this is safe. ----
    if packed_n <= 8:
        tm = packed_n                                # full-dim block is legal
    else:
        tm = min(int(tm_packed), packed_n)
        if _cdiv(packed_n, tm) < 2:
            tm = _cdiv(packed_n, 2)                  # split work across both TCs
        tm = _round_up(tm, 8)
    grid_m = _cdiv(packed_n, tm)
    if grid_m >= 3 and grid_m % 2 == 1:              # prefer an even step count
        tm_even = _round_up(_cdiv(packed_n, grid_m + 1), 8)
        if tm_even >= 8 and _cdiv(packed_n, tm_even) % 2 == 0:
            tm = tm_even
            grid_m = _cdiv(packed_n, tm)

    # ---- VMEM budget: double-buffered x tile + (lane-padded) out tile +
    # resident weights.  Set the scoped-VMEM limit explicitly so the large
    # default tiles also fit under v5e's 16 MiB default. ----
    x_itemsize = jnp.dtype(x_packed.dtype).itemsize
    x_tile_vmem = tm * _round_up(d_pack, 128) * x_itemsize
    out_tile_vmem = tm * 128 * 4                     # (tm, 4) f32, lane-padded
    vmem_needed = 2 * (x_tile_vmem + out_tile_vmem) + (2 << 20)
    vmem_limit = int(min(max(vmem_needed * 5 // 4, 16 << 20), 56 << 20))

    flops = 2 * n4 * (d_in * num_features + num_features)
    bytes_accessed = (x_packed.size * x_itemsize + n4 * 4
                      + w1_bd.size * x_itemsize
                      + 4 * (w2_bd.size + b1_t.size + 1))

    out = pl.pallas_call(
        _depthnet3_kernel,
        out_shape=jax.ShapeDtypeStruct((packed_n, ROW_PACK), jnp.float32),
        grid_spec=pltpu.PrefetchScalarGridSpec(
            num_scalar_prefetch=0,
            grid=(grid_m,),
            in_specs=[
                # x tiles stream through VMEM (double-buffered by Pallas).
                pl.BlockSpec((tm, d_pack), lambda i: (i, 0)),
                # weights / biases: constant index_map -> stay VMEM-resident.
                pl.BlockSpec((d_pack, f_pack), lambda i: (0, 0)),
                pl.BlockSpec((1, f_pack), lambda i: (0, 0)),
                pl.BlockSpec((f_pack, ROW_PACK), lambda i: (0, 0)),
                # b2: single scalar in SMEM (no per-tile VMEM DMA).
                pl.BlockSpec(memory_space=pltpu.MemorySpace.SMEM),
            ],
            out_specs=pl.BlockSpec((tm, ROW_PACK), lambda i: (i, 0)),
        ),
        compiler_params=pltpu.CompilerParams(
            dimension_semantics=("parallel",),       # shard row tiles over TCs
            vmem_limit_bytes=vmem_limit,
        ),
        cost_estimate=pl.CostEstimate(
            flops=flops, transcendentals=0, bytes_accessed=bytes_accessed),
    )(x_packed, w1_bd, b1_t, w2_bd, b2_s)

    # Unpack (packed_n, 4) -> (n4, 1) and drop the <= 3 padded rows.
    return out.reshape(n4, 1)[:N]


def _reference_np(x_nchw, w1, b1, w2, b2):
    """Float64 numpy ground truth (independent of TPU matmul precision)."""
    x = np.asarray(x_nchw, np.float64).reshape(np.shape(x_nchw)[0], -1)
    h = np.maximum(x @ np.asarray(w1, np.float64).T + np.asarray(b1, np.float64), 0.0)
    return h @ np.asarray(w2, np.float64).T + np.asarray(b2, np.float64)


if __name__ == "__main__":
    # Small shapes consistent with the module: nF*H*W == input_dim == 32.
    nF, H, W = 2, 4, 4
    input_dim = nF * H * W          # 32
    num_features = 16

    key = jax.random.PRNGKey(0)
    kx, kw1, kb1, kw2, kb2, kx2, kx3 = jax.random.split(key, 7)

    # PyTorch nn.Linear-style parameters (shape (out, in), uniform init).
    bound1 = 1.0 / (input_dim ** 0.5)
    w1 = jax.random.uniform(kw1, (num_features, input_dim), jnp.float32, -bound1, bound1)
    b1 = jax.random.uniform(kb1, (num_features,), jnp.float32, -bound1, bound1)
    bound2 = 1.0 / (num_features ** 0.5)
    w2 = jax.random.uniform(kw2, (1, num_features), jnp.float32, -bound2, bound2)
    b2 = jax.random.uniform(kb2, (1,), jnp.float32, -bound2, bound2)

    params_f32 = pack_depthnet3_params(w1, b1, w2, b2)

    # Tolerance accommodates bf16 MXU passes under DEFAULT matmul precision;
    # real indexing/packing bugs show up as O(1) errors.
    TOL = dict(atol=2e-2, rtol=2e-2)

    # 1) Small batch (N=8): N % 4 == 0 -> zero-copy path, single grid step.
    x = jax.random.normal(kx, (8, nF, H, W), dtype=jnp.float32)
    y = depthnet3_forward(x, params_f32)
    jax.block_until_ready(y)
    assert y.shape == (8, 1), y.shape
    assert np.allclose(np.asarray(y), _reference_np(x, w1, b1, w2, b2), **TOL)

    # 2) Larger non-multiple batch: <= 3-row pad, partial last grid block,
    #    two "parallel" grid steps (both v7x TensorCores busy).
    N2 = 4099
    x2 = jax.random.normal(kx2, (N2, nF, H, W), dtype=jnp.float32)
    y2 = depthnet3_forward(x2, params_f32)
    jax.block_until_ready(y2)
    assert y2.shape == (N2, 1), y2.shape
    assert np.allclose(np.asarray(y2), _reference_np(x2, w1, b1, w2, b2), **TOL)

    # 3) bf16 streaming of x (largest single HBM-bandwidth lever, ~2x).
    #    The reference uses the same bf16-rounded x / W1 so only kernel error
    #    (f32 accumulation order) is measured.
    params_bf16 = pack_depthnet3_params(w1, b1, w2, b2, x_dtype=jnp.bfloat16)
    N3 = 4096
    x3 = jax.random.normal(kx3, (N3, nF, H, W), dtype=jnp.float32).astype(jnp.bfloat16)
    y3 = depthnet3_forward(x3, params_bf16)
    jax.block_until_ready(y3)
    assert y3.shape == (N3, 1), y3.shape
    x3_f32 = np.asarray(x3.astype(jnp.float32))
    w1_bf_f32 = np.asarray(w1.astype(jnp.bfloat16).astype(jnp.float32))
    assert np.allclose(np.asarray(y3),
                       _reference_np(x3_f32, w1_bf_f32, b1, w2, b2), **TOL)

    print("KERNEL_OK")
</pallas_src>

<mosaic_0001>
module attributes {stable_mosaic.version = 11 : i64} {
  func.func @_depthnet3_kernel(%arg0: i32, %arg1: memref<2x128xf32, #tpu.memory_space<vmem>>, %arg2: memref<128x64xf32, #tpu.memory_space<vmem>>, %arg3: memref<1x64xf32, #tpu.memory_space<vmem>>, %arg4: memref<64x4xf32, #tpu.memory_space<vmem>>, %arg5: memref<1xf32, #tpu.memory_space<smem>>, %arg6: memref<2x4xf32, #tpu.memory_space<vmem>>) attributes {dimension_semantics = [#tpu.dimension_semantics<parallel>], iteration_bounds = array<i64: 1>, scalar_prefetch = 0 : i64, scratch_operands = 0 : i64, tpu.core_type = #tpu.core_type<tc>, window_params = [{transform_indices = @transform_0, window_bounds = array<i64: 2, 128>}, {pipeline_mode = #tpu.pipeline_mode<synchronous>, transform_indices = @transform_1, window_bounds = array<i64: 128, 64>}, {pipeline_mode = #tpu.pipeline_mode<synchronous>, transform_indices = @transform_2, window_bounds = array<i64: 1, 64>}, {pipeline_mode = #tpu.pipeline_mode<synchronous>, transform_indices = @transform_3, window_bounds = array<i64: 64, 4>}, {transform_indices = @transform_4, window_bounds = array<i64: 1>}, {transform_indices = @transform_5, window_bounds = array<i64: 2, 4>}]} {
    %c0 = arith.constant 0 : index
    %c0_0 = arith.constant 0 : index
    %0 = vector.load %arg1[%c0, %c0_0] : memref<2x128xf32, #tpu.memory_space<vmem>>, vector<2x128xf32>
    %c0_1 = arith.constant 0 : index
    %c0_2 = arith.constant 0 : index
    %1 = vector.load %arg2[%c0_1, %c0_2] : memref<128x64xf32, #tpu.memory_space<vmem>>, vector<128x64xf32>
    %cst = arith.constant dense<0.000000e+00> : vector<2x64xf32>
    %2 = tpu.matmul %0, %1, %cst {dimension_numbers = #tpu.dot_dimension_numbers<[1], [0], [0], [1], [0, 0, 1, 1], [], []>} : vector<2x128xf32>, vector<128x64xf32>, vector<2x64xf32> -> vector<2x64xf32>
    %c0_3 = arith.constant 0 : index
    %c0_4 = arith.constant 0 : index
    %3 = vector.load %arg3[%c0_3, %c0_4] : memref<1x64xf32, #tpu.memory_space<vmem>>, vector<1x64xf32>
    %4 = vector.broadcast %3 : vector<1x64xf32> to vector<2x64xf32>
    %5 = arith.addf %2, %4 : vector<2x64xf32>
    %cst_5 = arith.constant 0.000000e+00 : f32
    %6 = vector.broadcast %cst_5 : f32 to vector<2x64xf32>
    %7 = arith.maximumf %5, %6 : vector<2x64xf32>
    %c0_6 = arith.constant 0 : index
    %c0_7 = arith.constant 0 : index
    %8 = vector.load %arg4[%c0_6, %c0_7] : memref<64x4xf32, #tpu.memory_space<vmem>>, vector<64x4xf32>
    %cst_8 = arith.constant dense<0.000000e+00> : vector<2x4xf32>
    %9 = tpu.matmul %7, %8, %cst_8 {dimension_numbers = #tpu.dot_dimension_numbers<[1], [0], [0], [1], [0, 0, 1, 1], [], []>} : vector<2x64xf32>, vector<64x4xf32>, vector<2x4xf32> -> vector<2x4xf32>
    %c0_9 = arith.constant 0 : index
    %10 = memref.load %arg5[%c0_9] : memref<1xf32, #tpu.memory_space<smem>>
    %11 = vector.broadcast %10 : f32 to vector<2x4xf32>
    %12 = arith.addf %9, %11 : vector<2x4xf32>
    %c0_10 = arith.constant 0 : index
    %c0_11 = arith.constant 0 : index
    %13 = vector.load %arg6[%c0_10, %c0_11] : memref<2x4xf32, #tpu.memory_space<vmem>>, vector<2x4xf32>
    tpu.vector_store %arg6[%c0_10, %c0_11], %12 {strides = array<i32>} : memref<2x4xf32, #tpu.memory_space<vmem>>, vector<2x4xf32>,
    return
  }
  func.func @transform_0(%arg0: i32) -> (i32, i32) {
    %c0_i32 = arith.constant 0 : i32
    %c0_i32_0 = arith.constant 0 : i32
    return %arg0, %c0_i32 : i32, i32
  }
  func.func @transform_1(%arg0: i32) -> (i32, i32) {
    %c0_i32 = arith.constant 0 : i32
    %c0_i32_0 = arith.constant 0 : i32
    %c0_i32_1 = arith.constant 0 : i32
    return %c0_i32, %c0_i32_0 : i32, i32
  }
  func.func @transform_2(%arg0: i32) -> (i32, i32) {
    %c0_i32 = arith.constant 0 : i32
    %c0_i32_0 = arith.constant 0 : i32
    %c0_i32_1 = arith.constant 0 : i32
    return %c0_i32, %c0_i32_0 : i32, i32
  }
  func.func @transform_3(%arg0: i32) -> (i32, i32) {
    %c0_i32 = arith.constant 0 : i32
    %c0_i32_0 = arith.constant 0 : i32
    %c0_i32_1 = arith.constant 0 : i32
    return %c0_i32, %c0_i32_0 : i32, i32
  }
  func.func @transform_4(%arg0: i32) -> i32 {
    %c0_i32 = arith.constant 0 : i32
    %c0_i32_0 = arith.constant 0 : i32
    return %c0_i32 : i32
  }
  func.func @transform_5(%arg0: i32) -> (i32, i32) {
    %c0_i32 = arith.constant 0 : i32
    %c0_i32_0 = arith.constant 0 : i32
    return %arg0, %c0_i32 : i32, i32
  }
}

</mosaic_0001>

<bundles_post_ra>
// kernel: tpu_custom_call.1
= control target key start
LH: loop header
LB: loop body
LE: loop exit
PB: predicated region body
PF: predicated region fallthrough
CT: control target
= control target key end

     0   :  { %v363_v3 = vmov 0.0|0.0   ;;  %vm364_vm0 = vmmov 0   ;;  %v365_v6 = vmov 0.0   ;;  %s490_s0 = inlined_call_operand.vmem [shape: f32[2,128], index: 0, kind: input, shape index: {}]   ;;  %s491_s1 = inlined_call_operand.vmem [shape: f32[128,64], index: 1, kind: input, shape index: {}]   ;;  %s492_s2 = inlined_call_operand.vmem [shape: f32[1,64], index: 2, kind: input, shape index: {}]   ;;  %s493_s3 = inlined_call_operand.vmem [shape: f32[64,4], index: 3, kind: input, shape index: {}]   ;;  %s494_s4 = inlined_call_operand.<no memory space> [shape: f32[1], index: 4, kind: input, shape index: {}]   ;;  %s495_s5 = inlined_call_operand.hbm [shape: f32[2,4], index: 5, kind: output, shape index: {}]  }
   0x1   :  { %v23_v0 = vld [vmem:[%s491_s1] sm:$0xff]  ;;  %v24_v1 = vld [vmem:[%s491_s1 + $0x8] sm:$0xff]  ;;  %v25_v2 = vld [vmem:[%s491_s1 + $0x10] sm:$0xff]  ;;  %299 = vmatprep.subr.bf16.mxu0 %v363_v3  ;;  %277 = vmatprep.mubr.msk.f32.mxu0 %vm364_vm0, %v365_v6 }
   0x2   :  { %v300_v4 = vpack.c.bf16 %v24_v1, %v23_v0  ;;  %v26_v5 = vld [vmem:[%s491_s1 + $0x18] sm:$0xff]  ;;  %323 = vmatprep.subr.bf16.mxu1 %v363_v3  ;;  %296 = vmatprep.mubr.msk.f32.mxu1 %vm364_vm0, %v365_v6  ;;  %v27_v8 = vld [vmem:[%s491_s1 + $0x20] sm:$0xff]  ;;  %v28_v9 = vld [vmem:[%s491_s1 + $0x28] sm:$0xff] }
   0x3   :  { %v303_v7 = vpack.c.bf16 %v26_v5, %v25_v2  ;;  %v117_v10 = vld [vmem:[%s493_s3] sm:$0xff]  ;;  %v118_v11 = vld [vmem:[%s493_s3 + $0x8] sm:$0xff]  ;;  %v119_v12 = vld [vmem:[%s493_s3 + $0x10] sm:$0xff]  ;;  %v306_v14 = vpack.c.bf16 %v28_v9, %v27_v8 }
   0x4   :  { %301 = vmatpush3.bf16.msra.mxu0 %v300_v4  ;;  %v120_v13 = vld [vmem:[%s493_s3 + $0x18] sm:$0xff]  ;;  %v324_v15 = vpack.c.bf16 %v118_v11, %v117_v10  ;;  %v29_v16 = vld [vmem:[%s491_s1 + $0x30] sm:$0xff] }
   0x5   :  { %302 = vmatprep.subr.bf16.mxu0 %v363_v3  ;;  %v30_v17 = vld [vmem:[%s491_s1 + $0x38] sm:$0xff] }
   0x8   :  { %304 = vmatpush3.bf16.msra.mxu0 %v303_v7 }
   0x9   :  { %305 = vmatprep.subr.bf16.mxu0 %v363_v3 }
   0xa   :  { %11 = vsyncpa [#allocation4], 0  ;;  %325 = vmatpush3.bf16.msra.mxu1 %v324_v15  ;;  %v327_v18 = vpack.c.bf16 %v120_v13, %v119_v12  ;;  %v121_v19 = vld [vmem:[%s493_s3 + $0x20] sm:$0xff]  ;;  %v122_v20 = vld [vmem:[%s493_s3 + $0x28] sm:$0xff]  ;;  %v309_v21 = vpack.c.bf16 %v30_v17, %v29_v16  ;;  %vm127_vm1 = vcmask 523264   ;;  %v126_v44 = vstv %s494_s4  ;;  %s366_s20 = smov [#allocation3]  }
   0xb   :  { %326 = vmatprep.subr.bf16.mxu1 %v363_v3  ;;  %v31_v22 = vld [vmem:[%s491_s1 + $0x40] sm:$0xff]  ;;  %v32_v23 = vld [vmem:[%s491_s1 + $0x48] sm:$0xff]  ;;  %v330_v24 = vpack.c.bf16 %v122_v20, %v121_v19  ;;  %v33_v26 = vld [vmem:[%s491_s1 + $0x50] sm:$0xff]  ;;  %s209_s21 = sshll.u32 %s366_s20, 4  ;;  %vm201_vm2 = vcmask 25600   ;;  %s210_s21 = int_to_ptr.vmem [resolvable:$true] %s209_s21 }
   0xc   :  { %307 = vmatpush3.bf16.msra.mxu0 %v306_v14  ;;  %v312_v25 = vpack.c.bf16 %v32_v23, %v31_v22  ;;  %v34_v27 = vld [vmem:[%s491_s1 + $0x58] sm:$0xff]  ;;  %v35_v29 = vld [vmem:[%s491_s1 + $0x60] sm:$0xff]  ;;  %v36_v30 = vld [vmem:[%s491_s1 + $0x68] sm:$0xff]  ;;  %p344_p1 = scmp.lt.s32.totalorder %s210_s21, %s210_s21 }
   0xd   :  { %308 = vmatprep.subr.bf16.mxu0 %v363_v3  ;;  %v315_v28 = vpack.c.bf16 %v34_v27, %v33_v26  ;;  %v318_v31 = vpack.c.bf16 %v36_v30, %v35_v29  ;;  %v37_v32 = vld [vmem:[%s491_s1 + $0x70] sm:$0xff]  ;;  %v38_v33 = vld [vmem:[%s491_s1 + $0x78] sm:$0xff]  ;;  %v22_v35 = vld [vmem:[%s490_s0] sm:$0x3] }
   0xe   :  { %328 = vmatpush3.bf16.msra.mxu1 %v327_v18  ;;  %v321_v34 = vpack.c.bf16 %v38_v33, %v37_v32  ;;  %v123_v36 = vld [vmem:[%s493_s3 + $0x30] sm:$0xff]  ;;  %v124_v37 = vld [vmem:[%s493_s3 + $0x38] sm:$0xff]  ;;  %v217_v39 = vld [vmem:[%s492_s2] ss:$0 sm:$0xff]  ;;  %s339_s3 = scalar_lea.vmem %s210_s21, 32 }
   0xf   :  { %329 = vmatprep.subr.bf16.mxu1 %v363_v3  ;;  %v333_v38 = vpack.c.bf16 %v124_v37, %v123_v36  ;;  %p340_p0 = scmp.ne.s32.totalorder %s210_s21, %s339_s3  ;;  %p345_p2 = scmp.lt.s32.totalorder %s339_s3, %s339_s3 }
  0x10   :  { %310 = vmatpush3.bf16.msra.mxu0 %v309_v21 }
  0x11   :  { %311 = vmatprep.subr.bf16.mxu0 %v363_v3  ;;  %p346_p3 = por %p345_p2, %p344_p1 }
  0x12   :  { %331 = vmatpush3.bf16.msra.mxu1 %v330_v24 }
  0x13   :  { %332 = vmatprep.subr.bf16.mxu1 %v363_v3  ;;  %p347_p4 = pnand %p346_p3, %p340_p0 }
  0x14   :  { %313 = vmatpush3.bf16.msra.mxu0 %v312_v25 }
  0x15   :  { %314 = vmatprep.subr.bf16.mxu0 %v363_v3 }
  0x16   :  { %334 = vmatpush3.bf16.msra.mxu1 %v333_v38 }
  0x18   :  { %316 = vmatpush3.bf16.msra.mxu0 %v315_v28 }
  0x19   :  { %317 = vmatprep.subr.bf16.mxu0 %v363_v3 }
  0x1c   :  { %319 = vmatpush3.bf16.msra.mxu0 %v318_v31 }
  0x1d   :  { %320 = vmatprep.subr.bf16.mxu0 %v363_v3 }
  0x20   :  { %322 = vmatpush3.bf16.msra.mxu0 %v321_v34 }
  0x23   :  { %278 = vmatmul.mubr.f32.vlgmr.msra.gmra.mrb[0].mxu0 %v22_v35 }
  0xf6   :  { %v112_v40 = vpop.f32.mrb[0].mxu0 }
  0xf7   :  { %v113_v41 = vadd.f32 %v217_v39, %v112_v40  ;;  %v279_v42 = vpop.f32.mrb[1].mxu0 }
  0xf9   :  { %v116_v43 = vmax.f32 %v113_v41, 0.0 }
  0xfb   :  { %297 = vmatmul.mubr.msk.f32.vlgmr.msra.gmra.mrb[0].mxu1 %vm127_vm1, %v116_v43 }
 0x1ce   :  { %v197_v45 = vpop.f32.mrb[0].mxu1 }
 0x1cf   :  { %v198_v46 = vadd.f32 %v197_v45, %v126_v44  ;;  %v298_v47 = vpop.f32.mrb[1].mxu1 }
 0x1d1   :  { %202 = vst.msk [vmem:[#allocation3] sm:$0x3] %vm201_vm2, %v198_v46 }
 0x1d2   :  { %350 = shalt.err (!%p347_p4)
}
 0x1d3   :  { %s351_s23 = scalar_lea.hbm %s495_s5, 32 }
 0x1d4   :  { %p352_p5 = scmp.ne.s32.totalorder %s495_s5, %s351_s23  ;;  %p355_p6 = scmp.lt.u32.totalorder %s351_s23, %s495_s5 }
 0x1d6   :  { %p357_p7 = pnand %p355_p6, %p352_p5 }
 0x1d8   :  { %360 = shalt.err (!%p357_p7)
}
 0x1d9   :  { %212 = dma.vmem_to_hbm [thread:$0]  %s210_s21, 32, %s495_s5, [#allocation4]  }
 0x1da   :  { %361 = dma.done.wait [#allocation4], 32  }
 0x1db   :  { %362 = vsyncadd [#allocation4], 4294967264 }
 0x1dc   :  { %216 = vsyncpa [#allocation4], 1 }

</bundles_post_ra>
